<compile_context>
chip_gen: v5e
topology: v5e:2x2
jax: 0.10.0
libtpu: 0.0.40
codegen_flags: <defaults>
</compile_context>

<pallas_src>
import functools
import math

import jax
import jax.numpy as jnp
from jax.experimental import pallas as pl
from jax.experimental.pallas import tpu as pltpu

_MIB = 1024 * 1024


# ---------------------------------------------------------------------------
# small helpers
# ---------------------------------------------------------------------------
def _round_up(x, m):
    return (x + m - 1) // m * m


def _tile_vmem_bytes(rows, cols, dtype):
    itemsize = jnp.dtype(dtype).itemsize
    sublane = 8 * max(1, 4 // itemsize)          # f32: 8, bf16: 16, int8/fp8: 32
    return (_round_up(max(int(rows), 1), sublane)
            * _round_up(max(int(cols), 1), 128) * itemsize)


def _generation_params():
    """Returns (generation tag, scoped-VMEM cap to request, default query tile)."""
    try:
        kind = jax.devices()[0].device_kind.lower()
    except Exception:
        kind = ""
    if "v7" in kind:
        # 64 MiB physical per TensorCore: leave headroom for Mosaic scratch.
        return "v7", 52 * _MIB, 256
    if "v6" in kind:
        return "v6", 96 * _MIB, 256              # 128 MiB physical VMEM
    if "v5" in kind or "v4" in kind:
        return "v5", 96 * _MIB, 128              # 128 MiB physical VMEM
    return None, 48 * _MIB, 128                  # conservative default


def _legal_query_tile(t, lq):
    t = min(int(t), lq)
    if t < lq:
        t = max(8, (t // 8) * 8)                 # second-to-last block dim: x8
    return t


# ---------------------------------------------------------------------------
# single-pass kernel: full (padded) K/V resident per batch row
# ---------------------------------------------------------------------------
def _sdpa_kernel(q_ref, k_ref, v_ref, out_ref, *attn_refs, inv_temperature,
                 scale_scores, num_valid_keys, approx_reciprocal, exp_bf16):
    # Views (batch dim squeezed by the BlockSpecs):
    #   q_ref [TQ, D], k_ref/v_ref [Lk_pad, D], out_ref [TQ, D], attn [TQ, Lk_pad]
    q = q_ref[...]
    if not scale_scores:
        q = q * inv_temperature                  # weak-typed scalar: stays in q dtype

    # scores [TQ, Lk_pad]: contract D with D (no materialized k.T), f32 MXU acc.
    s = jax.lax.dot_general(q, k_ref[...],
                            dimension_numbers=(((1,), (1,)), ((), ())),
                            preferred_element_type=jnp.float32)
    if scale_scores:
        s = s * inv_temperature                  # scale f32 scores (bf16 inputs)
    if num_valid_keys is not None:               # mask padded key columns
        ids = jax.lax.broadcasted_iota(jnp.int32, s.shape, 1)
        s = jnp.where(ids < num_valid_keys, s, jnp.float32(-1e30))

    # numerically stable softmax over keys (matches F.softmax(dim=-1))
    m = jnp.max(s, axis=-1, keepdims=True)
    z = s - m
    if exp_bf16:
        e = jnp.exp(z.astype(jnp.bfloat16)).astype(jnp.float32)
    else:
        e = jnp.exp(z)
    denom = jnp.sum(e, axis=-1, keepdims=True)
    p = e * pl.reciprocal(denom, approx=approx_reciprocal)

    o = jnp.dot(p.astype(v_ref.dtype), v_ref[...],
                preferred_element_type=jnp.float32)
    out_ref[...] = o.astype(out_ref.dtype)
    if attn_refs:
        attn_refs[0][...] = p.astype(attn_refs[0].dtype)


def _sdpa_single_pass(q, k, v, tq, kv_buffers, lk_pad, inv_temperature,
                      scale_scores, approx_reciprocal, exp_bf16, out_dtype,
                      attn_dtype, return_attn, vmem_cap, headroom, vmem_need):
    B, Lq, D = q.shape
    Lk = k.shape[1]
    pad = lk_pad - Lk
    if pad:
        k = jnp.pad(k, ((0, 0), (0, pad), (0, 0)))
        v = jnp.pad(v, ((0, 0), (0, pad), (0, 0)))

    kernel = functools.partial(
        _sdpa_kernel,
        inv_temperature=inv_temperature,
        scale_scores=scale_scores,
        num_valid_keys=(Lk if pad else None),
        approx_reciprocal=approx_reciprocal,
        exp_bf16=exp_bf16)

    grid = (B, pl.cdiv(Lq, tq))
    # K/V block index only changes on the batch axis; single-buffer them when
    # VMEM is tight (kv_buffers == 1) to halve the dominant VMEM consumer.
    kv_kwargs = {} if kv_buffers == 2 else {"pipeline_mode": pl.Buffered(1)}
    in_specs = [
        pl.BlockSpec((None, tq, D), lambda b, i: (b, i, 0)),            # q tile
        pl.BlockSpec((None, lk_pad, D), lambda b, i: (b, 0, 0), **kv_kwargs),  # k
        pl.BlockSpec((None, lk_pad, D), lambda b, i: (b, 0, 0), **kv_kwargs),  # v
    ]
    out_shape = [jax.ShapeDtypeStruct((B, Lq, D), out_dtype)]
    out_specs = [pl.BlockSpec((None, tq, D), lambda b, i: (b, i, 0))]
    if return_attn:
        out_shape.append(jax.ShapeDtypeStruct((B, Lq, lk_pad), attn_dtype))
        out_specs.append(pl.BlockSpec((None, tq, lk_pad), lambda b, i: (b, i, 0)))

    def _nbytes(a):
        return int(a.size) * jnp.dtype(a.dtype).itemsize

    cost = pl.CostEstimate(
        flops=4 * B * Lq * lk_pad * D,
        transcendentals=B * Lq * lk_pad,
        bytes_accessed=(_nbytes(q) + _nbytes(k) + _nbytes(v)
                        + B * Lq * D * jnp.dtype(out_dtype).itemsize
                        + (B * Lq * lk_pad * jnp.dtype(attn_dtype).itemsize
                           if return_attn else 0)))

    vmem_limit = int(min(vmem_cap, max(32 * _MIB, vmem_need + headroom)))
    res = pl.pallas_call(
        kernel,
        out_shape=tuple(out_shape),
        grid_spec=pltpu.PrefetchScalarGridSpec(
            num_scalar_prefetch=0, grid=grid,
            in_specs=in_specs, out_specs=tuple(out_specs)),
        compiler_params=pltpu.CompilerParams(
            dimension_semantics=("parallel", "parallel"),
            vmem_limit_bytes=vmem_limit),
        cost_estimate=cost,
    )(q, k, v)

    out = res[0]
    if not return_attn:
        return out
    attn = res[1]
    if pad:
        attn = attn[..., :Lk]   # un-pad; lane-dense stores inside the kernel
    return out, attn


# ---------------------------------------------------------------------------
# Lk-tiled two-pass fallback (full K/V no longer fits in VMEM)
# ---------------------------------------------------------------------------
def _sdpa_stats_kernel(q_ref, k_ref, m_ref, l_ref, m_sc, l_sc, *,
                       inv_temperature, scale_scores, num_valid_keys, key_tile):
    j = pl.program_id(2)

    @pl.when(j == 0)
    def _():
        m_sc[...] = jnp.full(m_sc.shape, -jnp.inf, m_sc.dtype)
        l_sc[...] = jnp.zeros(l_sc.shape, l_sc.dtype)

    q = q_ref[...]
    if not scale_scores:
        q = q * inv_temperature
    s = jax.lax.dot_general(q, k_ref[...],
                            dimension_numbers=(((1,), (1,)), ((), ())),
                            preferred_element_type=jnp.float32)
    if scale_scores:
        s = s * inv_temperature
    ids = j * key_tile + jax.lax.broadcasted_iota(jnp.int32, s.shape, 1)
    s = jnp.where(ids < num_valid_keys, s, jnp.float32(-1e30))

    m_new = jnp.maximum(m_sc[...], jnp.max(s, axis=-1, keepdims=True))
    alpha = jnp.exp(m_sc[...] - m_new)
    l_sc[...] = alpha * l_sc[...] + jnp.sum(jnp.exp(s - m_new), axis=-1,
                                            keepdims=True)
    m_sc[...] = m_new

    @pl.when(j == pl.num_programs(2) - 1)
    def _():
        m_ref[...] = m_sc[...]
        l_ref[...] = l_sc[...]


def _sdpa_apply_kernel(q_ref, k_ref, v_ref, m_ref, l_ref, out_ref, *rest,
                       inv_temperature, scale_scores, num_valid_keys, key_tile,
                       approx_reciprocal):
    acc_sc = rest[-1]
    attn_ref = rest[0] if len(rest) == 2 else None
    j = pl.program_id(2)

    @pl.when(j == 0)
    def _():
        acc_sc[...] = jnp.zeros(acc_sc.shape, acc_sc.dtype)

    q = q_ref[...]
    if not scale_scores:
        q = q * inv_temperature
    s = jax.lax.dot_general(q, k_ref[...],
                            dimension_numbers=(((1,), (1,)), ((), ())),
                            preferred_element_type=jnp.float32)
    if scale_scores:
        s = s * inv_temperature
    ids = j * key_tile + jax.lax.broadcasted_iota(jnp.int32, s.shape, 1)
    s = jnp.where(ids < num_valid_keys, s, jnp.float32(-1e30))

    p = jnp.exp(s - m_ref[...]) * pl.reciprocal(l_ref[...],
                                                approx=approx_reciprocal)
    if attn_ref is not None:
        attn_ref[...] = p.astype(attn_ref.dtype)
    acc_sc[...] += jnp.dot(p.astype(v_ref.dtype), v_ref[...],
                           preferred_element_type=jnp.float32)

    @pl.when(j == pl.num_programs(2) - 1)
    def _():
        out_ref[...] = acc_sc[...].astype(out_ref.dtype)


def _sdpa_lk_tiled(q, k, v, tq, key_tile, inv_temperature, scale_scores,
                   approx_reciprocal, out_dtype, attn_dtype, return_attn,
                   vmem_cap, headroom):
    B, Lq, D = q.shape
    Lk = k.shape[1]

    def _pass2_need(tk_):
        need = 2 * _tile_vmem_bytes(tq, D, q.dtype)
        need += 2 * _tile_vmem_bytes(tk_, D, k.dtype)
        need += 2 * _tile_vmem_bytes(tk_, D, v.dtype)
        need += 2 * _tile_vmem_bytes(tq, D, out_dtype)
        need += 4 * _tile_vmem_bytes(tq, 1, jnp.float32)        # m, l blocks
        need += _tile_vmem_bytes(tq, D, jnp.float32)            # accumulator
        if return_attn:
            need += 2 * _tile_vmem_bytes(tq, tk_, attn_dtype)
        return need

    if key_tile is not None:
        tk = max(128, _round_up(int(key_tile), 128))
    else:
        tk = 128
        for cand in (512, 256, 128):
            if _pass2_need(cand) + headroom <= vmem_cap:
                tk = cand
                break

    lk_pad = _round_up(Lk, tk)
    pad = lk_pad - Lk
    if pad:
        k = jnp.pad(k, ((0, 0), (0, pad), (0, 0)))
        v = jnp.pad(v, ((0, 0), (0, pad), (0, 0)))

    grid = (B, pl.cdiv(Lq, tq), lk_pad // tk)

    def _nbytes(a):
        return int(a.size) * jnp.dtype(a.dtype).itemsize

    # ---- pass 1: softmax statistics (online row max + denominator) ---------
    stats_need = (2 * _tile_vmem_bytes(tq, D, q.dtype)
                  + 2 * _tile_vmem_bytes(tk, D, k.dtype)
                  + 6 * _tile_vmem_bytes(tq, 1, jnp.float32))
    m, l = pl.pallas_call(
        functools.partial(_sdpa_stats_kernel, inv_temperature=inv_temperature,
                          scale_scores=scale_scores, num_valid_keys=Lk,
                          key_tile=tk),
        out_shape=(jax.ShapeDtypeStruct((B, Lq, 1), jnp.float32),
                   jax.ShapeDtypeStruct((B, Lq, 1), jnp.float32)),
        grid_spec=pltpu.PrefetchScalarGridSpec(
            num_scalar_prefetch=0, grid=grid,
            in_specs=[pl.BlockSpec((None, tq, D), lambda b, i, j: (b, i, 0)),
                      pl.BlockSpec((None, tk, D), lambda b, i, j: (b, j, 0))],
            out_specs=(pl.BlockSpec((None, tq, 1), lambda b, i, j: (b, i, 0)),
                       pl.BlockSpec((None, tq, 1), lambda b, i, j: (b, i, 0))),
            scratch_shapes=[pltpu.VMEM((tq, 1), jnp.float32),
                            pltpu.VMEM((tq, 1), jnp.float32)]),
        compiler_params=pltpu.CompilerParams(
            dimension_semantics=("parallel", "parallel", "arbitrary"),
            vmem_limit_bytes=int(min(vmem_cap,
                                     max(32 * _MIB, stats_need + headroom)))),
        cost_estimate=pl.CostEstimate(
            flops=2 * B * Lq * lk_pad * D,
            transcendentals=B * Lq * lk_pad,
            bytes_accessed=_nbytes(q) + _nbytes(k) + 2 * B * Lq * 4),
    )(q, k)

    # ---- pass 2: probabilities, attn writeback, output accumulation --------
    out_shape = [jax.ShapeDtypeStruct((B, Lq, D), out_dtype)]
    out_specs = [pl.BlockSpec((None, tq, D), lambda b, i, j: (b, i, 0))]
    if return_attn:
        out_shape.append(jax.ShapeDtypeStruct((B, Lq, lk_pad), attn_dtype))
        out_specs.append(pl.BlockSpec((None, tq, tk), lambda b, i, j: (b, i, j)))

    res = pl.pallas_call(
        functools.partial(_sdpa_apply_kernel, inv_temperature=inv_temperature,
                          scale_scores=scale_scores, num_valid_keys=Lk,
                          key_tile=tk, approx_reciprocal=approx_reciprocal),
        out_shape=tuple(out_shape),
        grid_spec=pltpu.PrefetchScalarGridSpec(
            num_scalar_prefetch=0, grid=grid,
            in_specs=[pl.BlockSpec((None, tq, D), lambda b, i, j: (b, i, 0)),
                      pl.BlockSpec((None, tk, D), lambda b, i, j: (b, j, 0)),
                      pl.BlockSpec((None, tk, D), lambda b, i, j: (b, j, 0)),
                      pl.BlockSpec((None, tq, 1), lambda b, i, j: (b, i, 0)),
                      pl.BlockSpec((None, tq, 1), lambda b, i, j: (b, i, 0))],
            out_specs=tuple(out_specs),
            scratch_shapes=[pltpu.VMEM((tq, D), jnp.float32)]),
        compiler_params=pltpu.CompilerParams(
            dimension_semantics=("parallel", "parallel", "arbitrary"),
            vmem_limit_bytes=int(min(vmem_cap,
                                     max(32 * _MIB, _pass2_need(tk) + headroom)))),
        cost_estimate=pl.CostEstimate(
            flops=4 * B * Lq * lk_pad * D,
            transcendentals=B * Lq * lk_pad,
            bytes_accessed=(_nbytes(q) + _nbytes(k) + _nbytes(v)
                            + B * Lq * D * jnp.dtype(out_dtype).itemsize
                            + (B * Lq * lk_pad * jnp.dtype(attn_dtype).itemsize
                               if return_attn else 0))),
    )(q, k, v, m, l)

    out = res[0]
    if not return_attn:
        return out
    attn = res[1]
    if pad:
        attn = attn[..., :Lk]
    return out, attn


# ---------------------------------------------------------------------------
# public wrapper (mirrors ScaledDotProductAttention.forward)
# ---------------------------------------------------------------------------
def scaled_dot_product_attention(q, k, v, temperature, *, query_tile=None,
                                 key_tile=None, attn_dtype=None,
                                 return_attn=True, approx_reciprocal=False,
                                 exp_bf16=None, force_lk_tiled=None):
    """Pallas implementation of ScaledDotProductAttention.forward.

    Returns (output [B, Lq, D], attn [B, Lq, Lk]) by default; `attn_dtype`
    (e.g. jnp.bfloat16) halves the dominant attn HBM write, `return_attn=False`
    skips it entirely.  `approx_reciprocal=True` uses the approximate EUP
    reciprocal for the softmax normalization (rows then sum to 1 only approx.).
    """
    B, Lq, D = q.shape
    Bk, Lk, Dk = k.shape
    assert Bk == B and Dk == D and v.shape == (B, Lk, D)

    gen, vmem_cap, default_tq = _generation_params()
    out_dtype = q.dtype
    if attn_dtype is None:
        attn_dtype = q.dtype          # PyTorch-faithful default
    inv_temperature = 1.0 / float(temperature)
    scale_scores = q.dtype != jnp.float32       # scale f32 scores for bf16 inputs
    if exp_bf16 is None:
        exp_bf16 = bool(q.dtype == jnp.bfloat16 and D <= 64 and gen in ("v6", "v7"))
    headroom = 8 * _MIB

    # candidate query tiles (largest first)
    cands = (int(query_tile),) if query_tile is not None else (default_tq, 128, 64)
    tq_candidates = []
    for t in cands:
        t = _legal_query_tile(t, Lq)
        if t not in tq_candidates:
            tq_candidates.append(t)

    lk_pad128 = _round_up(Lk, 128)    # lane-dense attn stores

    def _single_pass_need(tq_, kv_buffers):
        need = 2 * _tile_vmem_bytes(tq_, D, q.dtype)
        need += kv_buffers * _tile_vmem_bytes(lk_pad128, D, k.dtype)
        need += kv_buffers * _tile_vmem_bytes(lk_pad128, D, v.dtype)
        need += 2 * _tile_vmem_bytes(tq_, D, out_dtype)
        if return_attn:
            need += 2 * _tile_vmem_bytes(tq_, lk_pad128, attn_dtype)
        return need

    # Prefer: (big TQ, double-buffered K/V) -> single-buffered K/V -> smaller TQ.
    config = None
    for tq_, kvb in [(tq_candidates[0], 2)] + [(t, 1) for t in tq_candidates]:
        if _single_pass_need(tq_, kvb) + headroom <= vmem_cap:
            config = (tq_, kvb)
            break
    if force_lk_tiled is True:
        config = None
    elif force_lk_tiled is False and config is None:
        config = (tq_candidates[-1], 1)         # explicit override: best effort

    if config is not None:
        tq_, kv_buffers = config
        return _sdpa_single_pass(
            q, k, v, tq_, kv_buffers, lk_pad128, inv_temperature, scale_scores,
            approx_reciprocal, exp_bf16, out_dtype, attn_dtype, return_attn,
            vmem_cap, headroom, _single_pass_need(tq_, kv_buffers))

    # Full K/V (+ attn tiles) do not fit: two-pass Lk-tiled path.
    return _sdpa_lk_tiled(
        q, k, v, tq_candidates[0], key_tile, inv_temperature, scale_scores,
        approx_reciprocal, out_dtype, attn_dtype, return_attn, vmem_cap, headroom)


# ---------------------------------------------------------------------------
# reference + tests
# ---------------------------------------------------------------------------
def _reference(q, k, v, temperature):
    attn = jnp.einsum("bqd,bkd->bqk", q.astype(jnp.float32) / temperature,
                      k.astype(jnp.float32))
    attn = jax.nn.softmax(attn, axis=-1)
    out = jnp.einsum("bqk,bkd->bqd", attn, v.astype(jnp.float32))
    return out, attn


if __name__ == "__main__":
    root = jax.random.PRNGKey(0)
    k1, k2, k3, k4, k5, k6 = jax.random.split(root, 6)

    # ---- small shapes consistent with the module forward -------------------
    B, Lq, Lk, D = 2, 8, 8, 32
    temperature = math.sqrt(D)
    q = jax.random.normal(k1, (B, Lq, D), dtype=jnp.float32)
    k = jax.random.normal(k2, (B, Lk, D), dtype=jnp.float32)
    v = jax.random.normal(k3, (B, Lk, D), dtype=jnp.float32)
    ref_out, ref_attn = _reference(q, k, v, temperature)

    # default path: single-pass, exact softmax normalization, Lk padded 8->128
    # inside the kernel (lane-dense stores), sliced back to Lk here.
    out, attn = scaled_dot_product_attention(q, k, v, temperature)
    out, attn = jax.block_until_ready((out, attn))
    assert out.shape == (B, Lq, D) and attn.shape == (B, Lq, Lk)
    assert jnp.allclose(out, ref_out, atol=3e-5, rtol=3e-5)
    assert jnp.allclose(attn, ref_attn, atol=3e-5, rtol=3e-5)

    # approximate EUP reciprocal in the softmax normalization (opt-in).
    out_a, attn_a = scaled_dot_product_attention(q, k, v, temperature,
                                                 approx_reciprocal=True)
    out_a, attn_a = jax.block_until_ready((out_a, attn_a))
    assert jnp.allclose(out_a, ref_out, atol=2e-2, rtol=2e-2)
    assert jnp.allclose(attn_a, ref_attn, atol=2e-2, rtol=2e-2)

    # reduced-writeback variants: output-only, and bf16 attention weights.
    out_only = scaled_dot_product_attention(q, k, v, temperature,
                                            return_attn=False)
    out_only = jax.block_until_ready(out_only)
    assert jnp.allclose(out_only, ref_out, atol=3e-5, rtol=3e-5)

    out_h, attn_h = scaled_dot_product_attention(q, k, v, temperature,
                                                 attn_dtype=jnp.bfloat16)
    out_h, attn_h = jax.block_until_ready((out_h, attn_h))
    assert attn_h.dtype == jnp.bfloat16
    assert jnp.allclose(attn_h.astype(jnp.float32), ref_attn, atol=1e-2, rtol=1e-2)

    # bf16 inputs: native bf16 MXU path with f32 accumulation.
    qb, kb, vb = (x.astype(jnp.bfloat16) for x in (q, k, v))
    ref_out_b, ref_attn_b = _reference(qb, kb, vb, temperature)
    out_b, attn_b = scaled_dot_product_attention(qb, kb, vb, temperature)
    out_b, attn_b = jax.block_until_ready((out_b, attn_b))
    assert jnp.allclose(out_b.astype(jnp.float32), ref_out_b, atol=5e-2, rtol=5e-2)
    assert jnp.allclose(attn_b.astype(jnp.float32), ref_attn_b, atol=5e-2, rtol=5e-2)

    # Lk-tiled two-pass fallback (used automatically when full K/V + attn tiles
    # exceed the per-generation VMEM budget); forced here with small tiles and
    # a non-128-multiple Lk to exercise masking, accumulation and un-padding.
    B2, Lq2, Lk2, D2 = 2, 16, 200, 32
    temperature2 = math.sqrt(D2)
    q2 = jax.random.normal(k4, (B2, Lq2, D2), dtype=jnp.float32)
    k2_ = jax.random.normal(k5, (B2, Lk2, D2), dtype=jnp.float32)
    v2 = jax.random.normal(k6, (B2, Lk2, D2), dtype=jnp.float32)
    ref_out2, ref_attn2 = _reference(q2, k2_, v2, temperature2)
    out2, attn2 = scaled_dot_product_attention(
        q2, k2_, v2, temperature2, force_lk_tiled=True,
        query_tile=8, key_tile=128)
    out2, attn2 = jax.block_until_ready((out2, attn2))
    assert out2.shape == (B2, Lq2, D2) and attn2.shape == (B2, Lq2, Lk2)
    assert jnp.allclose(out2, ref_out2, atol=1e-4, rtol=1e-4)
    assert jnp.allclose(attn2, ref_attn2, atol=1e-4, rtol=1e-4)

    print("KERNEL_OK")
</pallas_src>

<mosaic_0001>
module attributes {stable_mosaic.version = 11 : i64} {
  func.func @_sdpa_kernel(%arg0: i32, %arg1: i32, %arg2: memref<1x8x32xf32, #tpu.memory_space<vmem>>, %arg3: memref<1x128x32xf32, #tpu.memory_space<vmem>>, %arg4: memref<1x128x32xf32, #tpu.memory_space<vmem>>, %arg5: memref<1x8x32xf32, #tpu.memory_space<vmem>>, %arg6: memref<1x8x128xf32, #tpu.memory_space<vmem>>) attributes {dimension_semantics = [#tpu.dimension_semantics<parallel>, #tpu.dimension_semantics<parallel>], iteration_bounds = array<i64: 2, 1>, scalar_prefetch = 0 : i64, scratch_operands = 0 : i64, tpu.core_type = #tpu.core_type<tc>, window_params = [{transform_indices = @transform_0, window_bounds = array<i64: 1, 8, 32>}, {transform_indices = @transform_1, window_bounds = array<i64: 1, 128, 32>}, {transform_indices = @transform_2, window_bounds = array<i64: 1, 128, 32>}, {transform_indices = @transform_3, window_bounds = array<i64: 1, 8, 32>}, {transform_indices = @transform_4, window_bounds = array<i64: 1, 8, 128>}]} {
    %c0 = arith.constant 0 : index
    %c0_0 = arith.constant 0 : index
    %c0_1 = arith.constant 0 : index
    %0 = vector.load %arg2[%c0, %c0_0, %c0_1] : memref<1x8x32xf32, #tpu.memory_space<vmem>>, vector<1x8x32xf32>
    %1 = vector.shape_cast %0 : vector<1x8x32xf32> to vector<8x32xf32>
    %cst = arith.constant 0.176776692 : f32
    %2 = vector.broadcast %cst : f32 to vector<8x32xf32>
    %3 = arith.mulf %1, %2 : vector<8x32xf32>
    %c0_2 = arith.constant 0 : index
    %c0_3 = arith.constant 0 : index
    %c0_4 = arith.constant 0 : index
    %4 = vector.load %arg3[%c0_2, %c0_3, %c0_4] : memref<1x128x32xf32, #tpu.memory_space<vmem>>, vector<1x128x32xf32>
    %5 = vector.shape_cast %4 : vector<1x128x32xf32> to vector<128x32xf32>
    %cst_5 = arith.constant dense<0.000000e+00> : vector<8x128xf32>
    %6 = tpu.matmul %3, %5, %cst_5 {dimension_numbers = #tpu.dot_dimension_numbers<[1], [1], [0], [0], [0, 0, 1, 0], [], []>} : vector<8x32xf32>, vector<128x32xf32>, vector<8x128xf32> -> vector<8x128xf32>
    %7 = tpu.iota {dimensions = array<i32: 1>} : vector<8x128xi32>
    %c8_i32 = arith.constant 8 : i32
    %8 = vector.broadcast %c8_i32 : i32 to vector<8x128xi32>
    %9 = arith.cmpi slt, %7, %8 : vector<8x128xi32>
    %cst_6 = arith.constant -1.000000e+30 : f32
    %10 = vector.broadcast %cst_6 : f32 to vector<8x128xf32>
    %11 = arith.select %9, %6, %10 : vector<8x128xi1>, vector<8x128xf32>
    %cst_7 = arith.constant dense<0xFF800000> : vector<8xf32>
    %12 = vector.multi_reduction <maximumf>, %11, %cst_7 [1] : vector<8x128xf32> to vector<8xf32>
    %13 = vector.shape_cast %12 : vector<8xf32> to vector<8x1xf32>
    %14 = vector.broadcast %13 : vector<8x1xf32> to vector<8x128xf32>
    %15 = arith.subf %11, %14 : vector<8x128xf32>
    %16 = math.exp %15 : vector<8x128xf32>
    %cst_8 = arith.constant dense<0.000000e+00> : vector<8xf32>
    %17 = vector.multi_reduction <add>, %16, %cst_8 [1] : vector<8x128xf32> to vector<8xf32>
    %18 = vector.shape_cast %17 : vector<8xf32> to vector<8x1xf32>
    %19 = tpu.reciprocal %18 : vector<8x1xf32> -> vector<8x1xf32>
    %20 = vector.broadcast %19 : vector<8x1xf32> to vector<8x128xf32>
    %21 = arith.mulf %16, %20 : vector<8x128xf32>
    %c0_9 = arith.constant 0 : index
    %c0_10 = arith.constant 0 : index
    %c0_11 = arith.constant 0 : index
    %22 = vector.load %arg4[%c0_9, %c0_10, %c0_11] : memref<1x128x32xf32, #tpu.memory_space<vmem>>, vector<1x128x32xf32>
    %23 = vector.shape_cast %22 : vector<1x128x32xf32> to vector<128x32xf32>
    %cst_12 = arith.constant dense<0.000000e+00> : vector<8x32xf32>
    %24 = tpu.matmul %21, %23, %cst_12 {dimension_numbers = #tpu.dot_dimension_numbers<[1], [0], [0], [1], [0, 0, 1, 1], [], []>} : vector<8x128xf32>, vector<128x32xf32>, vector<8x32xf32> -> vector<8x32xf32>
    %c0_13 = arith.constant 0 : index
    %c0_14 = arith.constant 0 : index
    %c0_15 = arith.constant 0 : index
    %25 = vector.load %arg5[%c0_13, %c0_14, %c0_15] : memref<1x8x32xf32, #tpu.memory_space<vmem>>, vector<1x8x32xf32>
    %26 = vector.shape_cast %25 : vector<1x8x32xf32> to vector<8x32xf32>
    %27 = vector.shape_cast %24 : vector<8x32xf32> to vector<1x8x32xf32>
    tpu.vector_store %arg5[%c0_13, %c0_14, %c0_15], %27 {strides = array<i32>} : memref<1x8x32xf32, #tpu.memory_space<vmem>>, vector<1x8x32xf32>,
    %c0_16 = arith.constant 0 : index
    %c0_17 = arith.constant 0 : index
    %c0_18 = arith.constant 0 : index
    %28 = vector.load %arg6[%c0_16, %c0_17, %c0_18] : memref<1x8x128xf32, #tpu.memory_space<vmem>>, vector<1x8x128xf32>
    %29 = vector.shape_cast %28 : vector<1x8x128xf32> to vector<8x128xf32>
    %30 = vector.shape_cast %21 : vector<8x128xf32> to vector<1x8x128xf32>
    tpu.vector_store %arg6[%c0_16, %c0_17, %c0_18], %30 {strides = array<i32>} : memref<1x8x128xf32, #tpu.memory_space<vmem>>, vector<1x8x128xf32>,
    return
  }
  func.func @transform_0(%arg0: i32, %arg1: i32) -> (i32, i32, i32) {
    %c0_i32 = arith.constant 0 : i32
    %c0_i32_0 = arith.constant 0 : i32
    return %arg0, %arg1, %c0_i32 : i32, i32, i32
  }
  func.func @transform_1(%arg0: i32, %arg1: i32) -> (i32, i32, i32) {
    %c0_i32 = arith.constant 0 : i32
    %c0_i32_0 = arith.constant 0 : i32
    %c0_i32_1 = arith.constant 0 : i32
    return %arg0, %c0_i32, %c0_i32_0 : i32, i32, i32
  }
  func.func @transform_2(%arg0: i32, %arg1: i32) -> (i32, i32, i32) {
    %c0_i32 = arith.constant 0 : i32
    %c0_i32_0 = arith.constant 0 : i32
    %c0_i32_1 = arith.constant 0 : i32
    return %arg0, %c0_i32, %c0_i32_0 : i32, i32, i32
  }
  func.func @transform_3(%arg0: i32, %arg1: i32) -> (i32, i32, i32) {
    %c0_i32 = arith.constant 0 : i32
    %c0_i32_0 = arith.constant 0 : i32
    return %arg0, %arg1, %c0_i32 : i32, i32, i32
  }
  func.func @transform_4(%arg0: i32, %arg1: i32) -> (i32, i32, i32) {
    %c0_i32 = arith.constant 0 : i32
    %c0_i32_0 = arith.constant 0 : i32
    return %arg0, %arg1, %c0_i32 : i32, i32, i32
  }
}

</mosaic_0001>

<bundles_post_ra>
// kernel: tpu_custom_call.1
= control target key start
LH: loop header
LB: loop body
LE: loop exit
PB: predicated region body
PF: predicated region fallthrough
CT: control target
= control target key end

     0   :  { %10 = vsyncpa [#allocation3], 0  ;;  %s1016_s0 = inlined_call_operand.vmem [shape: f32[2,8,32], index: 0, kind: input, shape index: {}]   ;;  %s1017_s1 = inlined_call_operand.vmem [shape: f32[2,128,32], index: 1, kind: input, shape index: {}]   ;;  %s1018_s2 = inlined_call_operand.vmem [shape: f32[2,128,32], index: 2, kind: input, shape index: {}]   ;;  %s1019_s3 = inlined_call_operand.hbm [shape: f32[2,8,32], index: 3, kind: output, shape index: {0}]   ;;  %s1020_s4 = inlined_call_operand.hbm [shape: f32[2,8,128], index: 4, kind: output, shape index: {1}]  }
   0x1   :  { %12 = vsyncpa [#allocation3 + $0x1], 0 }
   0x2   :  { %13 = vsyncpa [#allocation5], 0 }
   0x3   :  { %15 = vsyncpa [#allocation5 + $0x1], 0  ;;  %s829_s15 = smov 0   ;;  %s831_s16 = smov 0  }
   0x4   :  { %s833_s17 = smov 0   ;;  %s835_s18 = smov 0  }
   0x5   :  { %s837_s19 = smov 0   ;;  %s839_s20 = smov 0  }
   0x6 LB: > { %s591_s21 = sadd.s32 4294967295, %s802_s20   ;;  %s592_s22 = sadd.s32 4294967294, %s802_s20   ;;  %s802_s20 = sphi %s839_s20, %s21_s20   ;;  %s798_s19 = sphi %s837_s19, %s1027_s19   ;;  %s794_s18 = sphi %s835_s18, %s1026_s18   ;;  %s790_s17 = sphi %s833_s17, %s1025_s17   ;;  %s786_s16 = sphi %s831_s16, %s1024_s16   ;;  %s782_s15 = sphi %s829_s15, %s1023_s15  }
   0x7   : > { %s33_s23 = sadd.s32 1, %s798_s19  ;;  %s122_s24 = sadd.s32 1, %s790_s17 }
   0x8   : > { %p35_p0 = scmp.ge.s32.totalorder %s33_s23, 2  ;;  %p132_p1 = scmp.ne.s32.totalorder %s790_s17, %s786_s16 }
   0x9   : > { %p133_p2 = scmp.eq.s32.totalorder %s591_s21, 1  ;;  %p138_p3 = scmp.ne.s32.totalorder %s786_s16, %s782_s15 }
   0xa   : > { %s1029_s23 = smov (%p35_p0, %s33_s23), 0  ;;  %p139_p5 = scmp.eq.s32.totalorder %s592_s22, 1 }
   0xb   : > { %p869_p4 = por %p133_p2, %p132_p1  ;;  %s117_s26 = ssub.s32 %s798_s19, %s1029_s23 }
   0xc   : > { %p595_p6 = scmp.ge.s32.totalorder %s802_s20, 1  ;;  %p120_p7 = scmp.eq.s32.totalorder %s117_s26, 0 }
   0xd   : > { %p876_p8 = por %p139_p5, %p138_p3  ;;  %p211_p9 = scmp.lt.s32.totalorder %s802_s20, 3 }
   0xe   : > { %s882_s28 = scalar_select %p120_p7, %s790_s17, %s122_s24  }
   0xf   : > { %p212_p10 = pnand %p595_p6, %p211_p9 }
  0x10   : > { %p254_p11 = scmp.lt.s32.totalorder (!%p212_p10), %s794_s18, 1  ;;  %s957_s21 = sand.u32 (!%p212_p10), 1, %s786_s16  }
  0x11   : > { %215 = sbr.rel (%p212_p10) target bundleno = 608 (0x260), region = 32  ;;  %s596_s22 = sshll.u32 (!%p212_p10), %s957_s21, 3 }
  0x12   : > { %s622_s24 = sshll.u32 (!%p212_p10), %s794_s18, 3  ;;  %s253_s5 = scalar_lea.vmem (!%p212_p10), [#allocation4], %s596_s22 }
  0x13   : > { %s459_s6 = sshll.u32 (!%p212_p10), %s253_s5, 4  ;;  %s712_s12 = scalar_lea.hbm (!%p212_p10), %s1020_s4, 16  ;;  %s460_s6 = int_to_ptr.vmem [resolvable:$true] %s459_s6 }
  0x16   : > { %s886_s29 = scalar_select %p254_p11, %s794_s18, 1  ;;  %vm289_vm0 = vcmask 261120   ;;  %v361_v18 = vlaneseq }
  0x18   : > { %s626_s30 = sshll.u32 %s886_s29, 7  ;;  %s598_s8 = sshll.u32 %s886_s29, 3  ;;  %v362_v19 = vand.u32 127, %v361_v18 }
  0x19   : > { %s894_s7 = scalar_lea.vmem %s1017_s1, %s626_s30  ;;  %s260_s11 = scalar_lea.vmem %s1016_s0, %s598_s8 }
  0x1a   : > { %v288_v0 = vld [vmem:[%s894_s7 + $0x78] sm:$0xff]  ;;  %v287_v1 = vld [vmem:[%s894_s7 + $0x70] sm:$0xff]  ;;  %v286_v2 = vld [vmem:[%s894_s7 + $0x68] sm:$0xff]  ;;  %vm363_vm1 = vcmp.lt.s32.totalorder %v362_v19, 8  ;;  %s938_s14 = scalar_lea.vmem %s1018_s2, %s626_s30  ;;  %s457_s30 = scalar_lea.hbm %s1020_s4, %s622_s24 }
  0x1b   : > { %603 = vmatpush.xpose.msk.msra.mxu0 %vm289_vm0, %v288_v0  ;;  %v285_v3 = vld [vmem:[%s894_s7 + $0x60] sm:$0xff]  ;;  %v284_v4 = vld [vmem:[%s894_s7 + $0x58] sm:$0xff]  ;;  %v283_v5 = vld [vmem:[%s894_s7 + $0x50] sm:$0xff]  ;;  %s431_s8 = scalar_lea.sflag [#allocation5], %s957_s21 }
  0x1c   : > { %v282_v6 = vld [vmem:[%s894_s7 + $0x48] sm:$0xff]  ;;  %v281_v7 = vld [vmem:[%s894_s7 + $0x40] sm:$0xff]  ;;  %v280_v8 = vld [vmem:[%s894_s7 + $0x38] sm:$0xff] }
  0x1d   : > { %v279_v9 = vld [vmem:[%s894_s7 + $0x30] sm:$0xff]  ;;  %v278_v10 = vld [vmem:[%s894_s7 + $0x28] sm:$0xff]  ;;  %v277_v11 = vld [vmem:[%s894_s7 + $0x20] sm:$0xff] }
  0x1e   : > { %v276_v12 = vld [vmem:[%s894_s7 + $0x18] sm:$0xff]  ;;  %v275_v13 = vld [vmem:[%s894_s7 + $0x10] sm:$0xff]  ;;  %v274_v14 = vld [vmem:[%s894_s7 + $0x8] sm:$0xff] }
  0x1f   : > { %604 = vmatpush.xpose.msk.msra.mxu0 %vm289_vm0, %v287_v1  ;;  %v271_v15 = vld [vmem:[%s260_s11] sm:$0xff]  ;;  %v402_v22 = vld [vmem:[%s938_s14 + $0x78] sm:$0xff]  ;;  %v401_v23 = vld [vmem:[%s938_s14 + $0x70] sm:$0xff] }
  0x20   : > { %v273_v16 = vld [vmem:[%s894_s7] sm:$0xff]  ;;  %v272_v17 = vmul.f32 0.17677669, %v271_v15  ;;  %403 = vmatpush.msra.mxu1 %v402_v22  ;;  %v400_v24 = vld [vmem:[%s938_s14 + $0x68] sm:$0xff]  ;;  %v398_v26 = vld [vmem:[%s938_s14 + $0x58] sm:$0xff]  ;;  %s461_s7 = sshll.u32 %s457_s30, 4  ;;  %s462_s7 = int_to_ptr.hbm [resolvable:$true] %s461_s7 }
  0x21   : > { %v399_v25 = vld [vmem:[%s938_s14 + $0x60] sm:$0xff]  ;;  %v397_v27 = vld [vmem:[%s938_s14 + $0x50] sm:$0xff]  ;;  %v396_v32 = vld [vmem:[%s938_s14 + $0x48] sm:$0xff]  ;;  %s706_s9 = sshra.s32 %s462_s7, 4  ;;  %s707_s9 = int_to_ptr.hbm [resolvable:$true] %s706_s9 }
  0x22   : > { %404 = vmatpush.msra.mxu1 %v401_v23  ;;  %v395_v33 = vld [vmem:[%s938_s14 + $0x40] sm:$0xff]  ;;  %v394_v34 = vld [vmem:[%s938_s14 + $0x38] sm:$0xff]  ;;  %v393_v35 = vld [vmem:[%s938_s14 + $0x30] sm:$0xff]  ;;  %s708_s18 = scalar_lea.hbm %s707_s9, 8  ;;  %p713_p1 = scmp.lt.s32.totalorder %s707_s9, %s1020_s4 }
  0x23   : > { %605 = vmatpush.xpose.msk.msra.mxu0 %vm289_vm0, %v286_v2  ;;  %v392_v36 = vld [vmem:[%s938_s14 + $0x28] sm:$0xff]  ;;  %v391_v37 = vld [vmem:[%s938_s14 + $0x20] sm:$0xff]  ;;  %v390_v38 = vld [vmem:[%s938_s14 + $0x18] sm:$0xff]  ;;  %p709_p12 = scmp.ne.s32.totalorder %s707_s9, %s708_s18  ;;  %p714_p2 = scmp.lt.s32.totalorder %s712_s12, %s708_s18 }
  0x24   : > { %405 = vmatpush.msra.mxu1 %v400_v24  ;;  %v389_v39 = vld [vmem:[%s938_s14 + $0x10] sm:$0xff]  ;;  %v388_v40 = vld [vmem:[%s938_s14 + $0x8] sm:$0xff]  ;;  %v387_v41 = vld [vmem:[%s938_s14] sm:$0xff] }
  0x25   : > { %p710_p13 = pnand %p709_p12, %p869_p4  ;;  %p715_p3 = por %p714_p2, %p713_p1 }
  0x26   : > { %406 = vmatpush.msra.mxu1 %v399_v25 }
  0x27   : > { %606 = vmatpush.xpose.msk.msra.mxu0 %vm289_vm0, %v285_v3  ;;  %p711_p0 = pneg %p710_p13 }
  0x28   : > { %407 = vmatpush.msra.mxu1 %v398_v26 }
  0x29   : > { %p716_p5 = pnand %p715_p3, %p711_p0 }
  0x2a   : > { %408 = vmatpush.msra.mxu1 %v397_v27 }
  0x2b   : > { %607 = vmatpush.xpose.msk.msra.mxu0 %vm289_vm0, %v284_v4 }
  0x2c   : > { %409 = vmatpush.msra.mxu1 %v396_v32 }
  0x2e   : > { %410 = vmatpush.msra.mxu1 %v395_v33 }
  0x2f   : > { %608 = vmatpush.xpose.msk.msra.mxu0 %vm289_vm0, %v283_v5 }
  0x30   : > { %411 = vmatpush.msra.mxu1 %v394_v34 }
  0x32   : > { %412 = vmatpush.msra.mxu1 %v393_v35 }
  0x33   : > { %609 = vmatpush.xpose.msk.msra.mxu0 %vm289_vm0, %v282_v6 }
  0x34   : > { %413 = vmatpush.msra.mxu1 %v392_v36 }
  0x36   : > { %414 = vmatpush.msra.mxu1 %v391_v37 }
  0x37   : > { %610 = vmatpush.xpose.msk.msra.mxu0 %vm289_vm0, %v281_v7 }
  0x38   : > { %415 = vmatpush.msra.mxu1 %v390_v38 }
  0x3a   : > { %416 = vmatpush.msra.mxu1 %v389_v39 }
  0x3b   : > { %611 = vmatpush.xpose.msk.msra.mxu0 %vm289_vm0, %v280_v8 }
  0x3c   : > { %417 = vmatpush.msra.mxu1 %v388_v40 }
  0x3e   : > { %418 = vmatpush.msra.mxu1 %v387_v41 }
  0x3f   : > { %612 = vmatpush.xpose.msk.msra.mxu0 %vm289_vm0, %v279_v9 }
  0x43   : > { %613 = vmatpush.xpose.msk.msra.mxu0 %vm289_vm0, %v278_v10 }
  0x47   : > { %614 = vmatpush.xpose.msk.msra.mxu0 %vm289_vm0, %v277_v11 }
  0x4b   : > { %615 = vmatpush.xpose.msk.msra.mxu0 %vm289_vm0, %v276_v12 }
  0x4f   : > { %616 = vmatpush.xpose.msk.msra.mxu0 %vm289_vm0, %v275_v13 }
  0x53   : > { %617 = vmatpush.xpose.msk.msra.mxu0 %vm289_vm0, %v274_v14 }
  0x57   : > { %618 = vmatpush.xpose.msk.msra.mxu0 %vm289_vm0, %v273_v16 }
  0x5a   : > { %619 = vmatmul.msk.f32.vlgmr.msra.gmra.mxu0 %vm289_vm0, %v272_v17 }
  0xd7   : > { %v358_v20 = vpop.f32.mrf.mxu0 }
  0xd8   : > { %v364_v21 = vsel %vm363_vm1, %v358_v20, -1e+30 }
  0xd9   : > { %365 = vmax.xlane.f32.xlu0 %v364_v21 }
 0x14c   : > { %v366_v28 = vpop.xlane.xlu0 %365 }
 0x14d   : > { %v367_v29 = vsub.f32 %v364_v21, %v366_v28 }
 0x14f   : > { %v368_v30 = vmul.f32 1.442695, %v367_v29 }
 0x151   : > { %688 = vpow2.f32 %v368_v30 }
 0x157   : > { %v689_v31 = vpop.eup %688 }
 0x158   : > { %370 = vadd.xlane.f32.xlu0 %v689_v31 }
 0x1cb   : > { %v371_v42 = vpop.xlane.xlu0 %370 }
 0x1cc   : > { %690 = vrcp.f32 %v371_v42  ;;  %v383_v46 = vand.u32 2147483648, %v371_v42  ;;  %v381_v48 = vand.u32 2147483647, %v371_v42  ;;  %vm377_vm3 = vweird.f32 %v371_v42 }
 0x1ce   : > { %v384_v50 = vor.u32 1.1754944e-38, %v383_v46  ;;  %vm382_vm5 = vcmp.eq.f32.partialorder %v381_v48, 8.507059e+37 }
 0x1d2   : > { %v691_v43 = vpop.eup %690 }
 0x1d3   : > { %v373_v44 = vmul.f32 %v691_v43, %v371_v42  ;;  %vm378_vm2 = vweird.f32 %v691_v43 }
 0x1d4   : > { %vm379_vm4 = vmor %vm377_vm3, %vm378_vm2 }
 0x1d5   : > { %v374_v45 = vsub.f32 1.0, %v373_v44 }
 0x1d7   : > { %v375_v47 = vmul.f32 %v691_v43, %v374_v45 }
 0x1d9   : > { %v376_v49 = vadd.f32 %v691_v43, %v375_v47 }
 0x1db   : > { %v380_v51 = vsel %vm379_vm4, %v691_v43, %v376_v49 }
 0x1dc   : > { %v385_v52 = vsel %vm382_vm5, %v384_v50, %v380_v51 }
 0x1dd   : > { %v386_v53 = vmul.f32 %v689_v31, %v385_v52 }
 0x1df   : > { %419 = vmatmul.f32.vlgmr.msra.gmra.mxu1 %v386_v53  ;;  %424 = vst [vmem:[%s253_s5] sm:$0xff] %v386_v53 }
 0x1e0   : > { %719 = shalt.err (!%p716_p5)
}
 0x1e1   : > { %629 = dma.vmem_to_hbm [thread:$0]  (%p869_p4), %s460_s6, 128, %s462_s7, %s431_s8  }
 0x1e2   : > { %s442_s30 = scalar_lea.hbm %s1019_s3, %s622_s24  ;;  %s246_s5 = scalar_lea.vmem [#allocation2], %s596_s22 }
 0x1e3   : > { %s444_s10 = sshll.u32 %s246_s5, 4  ;;  %s446_s11 = sshll.u32 %s442_s30, 4  ;;  %s445_s10 = int_to_ptr.vmem [resolvable:$true] %s444_s10  ;;  %s447_s11 = int_to_ptr.hbm [resolvable:$true] %s446_s11 }
 0x1e4   : > { %s426_s9 = scalar_lea.sflag [#allocation3], %s957_s21  ;;  %s734_s18 = sshra.s32 %s447_s11, 4  ;;  %s735_s18 = int_to_ptr.hbm [resolvable:$true] %s734_s18 }
 0x1e5   : > { %s736_s12 = scalar_lea.hbm %s735_s18, 8  ;;  %s740_s24 = scalar_lea.hbm %s1019_s3, 16 }
 0x1e6   : > { %p737_p6 = scmp.ne.s32.totalorder %s735_s18, %s736_s12  ;;  %p741_p10 = scmp.lt.s32.totalorder %s735_s18, %s1019_s3 }
 0x1e7   : > { %p742_p11 = scmp.lt.s32.totalorder %s740_s24, %s736_s12 }
 0x1e8   : > { %p738_p7 = pnand %p737_p6, %p869_p4 }
 0x1e9   : > { %p743_p12 = por %p742_p11, %p741_p10 }
 0x1ea   : > { %p739_p9 = pneg %p738_p7 }
 0x1ec   : > { %p744_p13 = pnand %p743_p12, %p739_p9 }
 0x25c   : > { %v420_v54 = vpop.f32.mrf.mxu1 }
 0x25d   : > { %423 = vst.msk [vmem:[%s246_s5] sm:$0xff] %vm289_vm0, %v420_v54 }
 0x25e   : > { %747 = shalt.err (!%p744_p13)
}
 0x25f   : > { %628 = dma.vmem_to_hbm [thread:$0]  (%p869_p4), %s445_s10, 128, %s447_s11, %s426_s9  }
 0x260 PF: > { %p639_p0 = scmp.ge.s32.totalorder %s802_s20, 2  ;;  %s473_s21 = sand.u32 1, %s782_s15  }
 0x261   : > { %s474_s13 = scalar_lea.sflag [#allocation3], %s473_s21 }
 0x262   : > { %p633_p1 = pnand %p639_p0, %p876_p8 }
 0x264   : > { %p634_p2 = pneg %p633_p1 }
 0x266   : > { %773 = dma.done.wait (%p634_p2), %s474_s13, 128  }
 0x267   : > { %775 = vsyncadd (%p634_p2), %s474_s13, 4294967168  ;;  %s484_s14 = scalar_lea.sflag [#allocation5], %s473_s21 }
 0x268   : > { %777 = dma.done.wait (%p634_p2), %s484_s14, 128  }
 0x269   : > { %779 = vsyncadd (%p634_p2), %s484_s14, 4294967168  ;;  %s21_s20 = sadd.s32 1, %s802_s20   ;;  %s1023_s15 = smov %s786_s16 }
 0x26a   : > { %p18_p3 = scmp.ge.s32.totalorder %s21_s20, 4   ;;  %s1024_s16 = smov %s790_s17 }
 0x26b   : > { %s1025_s17 = smov %s882_s28  ;;  %s1026_s18 = smov %s798_s19 }
 0x26c   : > { %s1027_s19 = smov %s1029_s23  ;;  %20 = sbr.rel (!%p18_p3) target bundleno = 6 (0x6), region = 90 }
 0x271   :  { %490 = vsyncpa [#allocation3], 1 }
 0x272   :  { %492 = vsyncpa [#allocation3 + $0x1], 1 }
 0x273   :  { %493 = vsyncpa [#allocation5], 1 }
 0x274   :  { %495 = vsyncpa [#allocation5 + $0x1], 1 }

</bundles_post_ra>
